<compile_context>
chip_gen: v6e
topology: v6e:2x2x1
jax: 0.10.0
libtpu: 0.0.40
codegen_flags: <defaults>
</compile_context>

<pallas_src>
import jax
import jax.numpy as jnp
from jax.experimental import pallas as pl
from jax.experimental.pallas import tpu as pltpu


def _round_up(x, m):
    return (x + m - 1) // m * m


def _cdiv(a, b):
    return (a + b - 1) // b


def _vmem_capacity_bytes():
    """Best-effort physical VMEM size; conservative fallback (v7x = 64 MiB)."""
    try:
        info = pltpu.get_tpu_info()
        for name in ("vmem_capacity_bytes", "vmem_size_bytes", "vmem_bytes"):
            cap = getattr(info, name, None)
            if cap:
                return int(cap)
    except Exception:
        pass
    return 64 * 1024 * 1024


def _make_gcn_kernel(tb, tm, n_pad, in_pad, out_pad, aggregate_first, compute_dtype):
    """Kernel with static tile sizes / matmul order baked in.

    Refs:
      alpha_ref: (1, 1)             f32, SMEM
      seq_ref:   (tb, n_pad, in_pad)   bf16 or f32 (cast in-kernel)
      adj_ref:   (tb, tm, n_pad)       bf16 or f32 (row tile of adjacency)
      w_ref:     (in_pad, out_pad)     bf16, pre-transposed
      b_ref:     (1, out_pad)          f32
      out_ref:   (tb, tm, out_pad)     out dtype (bf16 by default)
      fts_ref:   (tb, n_pad, out_pad)  bf16 scratch (linear-first path only)
    """
    if aggregate_first:
        # (adj @ seq) @ W : under row tiling this has no redundant work and
        # needs no scratch, so it is the default whenever in_pad <= out_pad.
        def kernel(alpha_ref, seq_ref, adj_ref, w_ref, b_ref, out_ref):
            adj = adj_ref[...].astype(compute_dtype)
            seq = seq_ref[...].astype(compute_dtype)
            agg = jnp.einsum("brn,bnk->brk", adj, seq,
                             preferred_element_type=jnp.float32)
            agg2d = agg.astype(compute_dtype).reshape(tb * tm, in_pad)
            out = jnp.dot(agg2d, w_ref[...], preferred_element_type=jnp.float32)
            out = out.reshape(tb, tm, out_pad) + b_ref[...]
            alpha = alpha_ref[0, 0]
            out_ref[...] = jnp.where(out > 0.0, out, alpha * out).astype(out_ref.dtype)
    else:
        # adj @ (seq @ W): fts hoisted into VMEM scratch, computed once per
        # batch tile (row-tile 0) and reused by every row tile.
        def kernel(alpha_ref, seq_ref, adj_ref, w_ref, b_ref, out_ref, fts_ref):
            @pl.when(pl.program_id(1) == 0)
            def _():
                seq2d = seq_ref[...].astype(compute_dtype).reshape(tb * n_pad, in_pad)
                fts = jnp.dot(seq2d, w_ref[...], preferred_element_type=jnp.float32)
                fts_ref[...] = fts.reshape(tb, n_pad, out_pad).astype(compute_dtype)

            adj = adj_ref[...].astype(compute_dtype)
            out = jnp.einsum("brn,bnf->brf", adj, fts_ref[...],
                             preferred_element_type=jnp.float32)
            out = out + b_ref[...]
            alpha = alpha_ref[0, 0]
            out_ref[...] = jnp.where(out > 0.0, out, alpha * out).astype(out_ref.dtype)

    return kernel


def gcn_forward(seq, adj, weight, bias, prelu_alpha, *,
                compute_dtype=jnp.bfloat16, out_dtype=jnp.bfloat16):
    """seq: (B, N, in_ft), adj: (B, N, N), weight: (out_ft, in_ft) [PyTorch layout],
    bias: (out_ft,), prelu_alpha: scalar. Returns (B, N, out_ft) in out_dtype."""
    B, N, in_ft = seq.shape
    out_ft = weight.shape[0]

    # --- padding policy ----------------------------------------------------
    # Node dim: 16 = bf16 sublane pack; 128 once graphs are big enough that a
    # lane-dense bmm contraction is worth the quadratic pad on adj.
    n_pad = _round_up(N, 128) if N >= 64 else _round_up(N, 16)
    in_pad = _round_up(in_ft, 128)    # lane-dense seq loads / MXU K
    out_pad = _round_up(out_ft, 128)  # lane-dense (unmasked) output stores

    # Matmul order (static). Note this compares *padded* dims: for any
    # in_ft, out_ft <= 128 both pad to 128 (padded FLOPs are what the MXU
    # actually executes) and we default to aggregate-first (no fts scratch).
    aggregate_first = in_pad <= out_pad

    # --- per-generation VMEM policy -----------------------------------------
    vmem_cap = _vmem_capacity_bytes()
    vmem_limit = int(min(vmem_cap * 7 // 8, 100 * 1024 * 1024))  # ~56 MiB v7x, ~100 MiB v5e/v6e

    c_isz = jnp.dtype(compute_dtype).itemsize
    o_isz = jnp.dtype(out_dtype).itemsize
    # Inputs that need no padding are passed in their original dtype and cast
    # on the VPU in-kernel (skips a full HBM repack pass).
    seq_isz = c_isz if (n_pad != N or in_pad != in_ft) else jnp.dtype(seq.dtype).itemsize
    adj_isz = c_isz if (n_pad != N) else jnp.dtype(adj.dtype).itemsize

    # Fixed VMEM: weight (counted double-buffered even though we request
    # Buffered(1)) + bias + a margin for compiler temporaries.
    fixed = 2 * in_pad * out_pad * c_isz + 2 * out_pad * 4 + (2 << 20)
    budget = max(vmem_limit - fixed, 4 << 20)

    def step_bytes(tb_, tm_):
        seq_b = 2 * tb_ * n_pad * in_pad * seq_isz              # double-buffered
        adj_b = 2 * tb_ * tm_ * n_pad * adj_isz                 # double-buffered
        out_b = 2 * tb_ * tm_ * out_pad * o_isz                 # double-buffered
        fts_b = 0 if aggregate_first else tb_ * n_pad * out_pad * c_isz
        tmp_b = 2 * tb_ * tm_ * max(in_pad, out_pad) * 4        # f32 intermediates
        return seq_b + adj_b + out_b + fts_b + tmp_b

    # Row tile over nodes: full n_pad if it fits at tb=1, otherwise the
    # largest multiple of 128 dividing n_pad that does (removes the VMEM
    # cap on graph size; output rows stay lane-dense).
    tm = n_pad
    if step_bytes(1, n_pad) > budget and n_pad % 128 == 0:
        tm = 128
        for cand in range(n_pad - 128, 127, -128):
            if n_pad % cand == 0 and step_bytes(1, cand) <= budget:
                tm = cand
                break

    # Batch tile: as large as fits the budget, but capped at ceil(B/2) so the
    # parallel batch axis always has >= 2 grid steps (keeps both v7x TCs busy;
    # negligible cost on single-TC v5e/v6e).
    tb = max(1, budget // max(1, step_bytes(1, tm)))
    if B >= 2:
        tb = min(tb, _cdiv(B, 2))
    tb = min(tb, B)
    B_pad = _round_up(B, tb)           # pad awkward B instead of tb -> 1
    grid = (B_pad // tb, n_pad // tm)

    # --- host-side operand prep ---------------------------------------------
    w_t = jnp.zeros((in_pad, out_pad), compute_dtype).at[:in_ft, :out_ft].set(
        weight.T.astype(compute_dtype))           # pre-transposed: no w.T in-kernel
    bias_p = jnp.zeros((1, out_pad), jnp.float32).at[0, :out_ft].set(
        bias.astype(jnp.float32))
    alpha_smem = jnp.asarray(prelu_alpha, jnp.float32).reshape(1, 1)

    if (B_pad != B) or (n_pad != N) or (in_pad != in_ft):
        seq_in = jnp.zeros((B_pad, n_pad, in_pad), compute_dtype).at[
            :B, :N, :in_ft].set(seq.astype(compute_dtype))
    else:
        seq_in = seq                                   # cast in-kernel
    if (B_pad != B) or (n_pad != N):
        adj_in = jnp.zeros((B_pad, n_pad, n_pad), compute_dtype).at[
            :B, :N, :N].set(adj.astype(compute_dtype))
    else:
        adj_in = adj                                   # cast in-kernel

    kernel = _make_gcn_kernel(tb, tm, n_pad, in_pad, out_pad,
                              aggregate_first, compute_dtype)
    scratch = [] if aggregate_first else [
        pltpu.VMEM((tb, n_pad, out_pad), compute_dtype)]
    row_sem = "parallel" if aggregate_first else "arbitrary"

    def _build_and_run(single_buffer_consts):
        const_kw = dict(pipeline_mode=pl.Buffered(1)) if single_buffer_consts else {}
        return pl.pallas_call(
            kernel,
            out_shape=jax.ShapeDtypeStruct((B_pad, n_pad, out_pad), out_dtype),
            grid_spec=pltpu.PrefetchScalarGridSpec(
                num_scalar_prefetch=0,
                grid=grid,
                in_specs=[
                    pl.BlockSpec(memory_space=pltpu.SMEM),                        # alpha
                    pl.BlockSpec((tb, n_pad, in_pad), lambda b, r: (b, 0, 0)),    # seq
                    pl.BlockSpec((tb, tm, n_pad), lambda b, r: (b, r, 0)),        # adj row tile
                    pl.BlockSpec((in_pad, out_pad), lambda b, r: (0, 0), **const_kw),  # W^T
                    pl.BlockSpec((1, out_pad), lambda b, r: (0, 0), **const_kw),       # bias
                ],
                out_specs=pl.BlockSpec((tb, tm, out_pad), lambda b, r: (b, r, 0)),
                scratch_shapes=scratch,
            ),
            compiler_params=pltpu.CompilerParams(
                dimension_semantics=("parallel", row_sem),
                vmem_limit_bytes=vmem_limit,
            ),
        )(alpha_smem, seq_in, adj_in, w_t, bias_p)

    try:
        out_p = _build_and_run(True)
    except Exception:
        # Installed Pallas may not support per-BlockSpec pipeline_mode; retry
        # with default (double-buffered) grid-invariant operands.
        out_p = _build_and_run(False)

    # Strip padding.
    return out_p[:B, :N, :out_ft]


if __name__ == "__main__":
    key = jax.random.PRNGKey(0)
    B, N, in_ft, out_ft = 2, 16, 32, 32

    k_seq, k_adj, k_w = jax.random.split(key, 3)
    seq = jax.random.normal(k_seq, (B, N, in_ft), dtype=jnp.float32)
    adj = jax.random.uniform(k_adj, (B, N, N), dtype=jnp.float32)

    # Parameter init matching the module:
    #   Linear weight: xavier_uniform_; bias param: 0.0; PReLU alpha: 0.25
    bound = (6.0 / (in_ft + out_ft)) ** 0.5
    weight = jax.random.uniform(
        k_w, (out_ft, in_ft), dtype=jnp.float32, minval=-bound, maxval=bound)
    bias = jnp.zeros((out_ft,), dtype=jnp.float32)
    prelu_alpha = 0.25

    out = gcn_forward(seq, adj, weight, bias, prelu_alpha)
    out = jax.block_until_ready(out)

    # Pure-f32 reference of the module's dense forward. The kernel uses bf16
    # MXU operands (f32 accumulation) and a bf16 output store, so the
    # tolerance covers bf16 rounding of both matmuls and the store.
    fts = jnp.einsum("bni,oi->bno", seq, weight)
    ref = jnp.einsum("bnk,bkf->bnf", adj, fts) + bias
    ref = jnp.where(ref > 0, ref, prelu_alpha * ref)

    out_f32 = out.astype(jnp.float32)
    assert out.shape == (B, N, out_ft)
    max_err = float(jnp.max(jnp.abs(out_f32 - ref)))
    assert jnp.allclose(out_f32, ref, atol=1e-1, rtol=1e-1), max_err

    print("KERNEL_OK")
</pallas_src>

<mosaic_0001>
module attributes {stable_mosaic.version = 11 : i64} {
  func.func @kernel(%arg0: i32, %arg1: i32, %arg2: memref<1x1xf32, #tpu.memory_space<smem>>, %arg3: memref<1x16x128xbf16, #tpu.memory_space<vmem>>, %arg4: memref<1x16x16xf32, #tpu.memory_space<vmem>>, %arg5: memref<128x128xbf16, #tpu.memory_space<vmem>>, %arg6: memref<1x128xf32, #tpu.memory_space<vmem>>, %arg7: memref<1x16x128xbf16, #tpu.memory_space<vmem>>) attributes {dimension_semantics = [#tpu.dimension_semantics<parallel>, #tpu.dimension_semantics<parallel>], iteration_bounds = array<i64: 2, 1>, scalar_prefetch = 0 : i64, scratch_operands = 0 : i64, tpu.core_type = #tpu.core_type<tc>, window_params = [{transform_indices = @transform_0, window_bounds = array<i64: 1, 1>}, {transform_indices = @transform_1, window_bounds = array<i64: 1, 16, 128>}, {transform_indices = @transform_2, window_bounds = array<i64: 1, 16, 16>}, {pipeline_mode = #tpu.pipeline_mode<synchronous>, transform_indices = @transform_3, window_bounds = array<i64: 128, 128>}, {pipeline_mode = #tpu.pipeline_mode<synchronous>, transform_indices = @transform_4, window_bounds = array<i64: 1, 128>}, {transform_indices = @transform_5, window_bounds = array<i64: 1, 16, 128>}]} {
    %c0 = arith.constant 0 : index
    %c0_0 = arith.constant 0 : index
    %c0_1 = arith.constant 0 : index
    %0 = vector.load %arg4[%c0, %c0_0, %c0_1] : memref<1x16x16xf32, #tpu.memory_space<vmem>>, vector<1x16x16xf32>
    %1 = arith.truncf %0 : vector<1x16x16xf32> to vector<1x16x16xbf16>
    %c0_2 = arith.constant 0 : index
    %c0_3 = arith.constant 0 : index
    %c0_4 = arith.constant 0 : index
    %2 = vector.load %arg3[%c0_2, %c0_3, %c0_4] : memref<1x16x128xbf16, #tpu.memory_space<vmem>>, vector<1x16x128xbf16>
    "tpu.trace_start"() <{level = 10 : i32, message = "brn,bnk->brk"}> : () -> ()
    %cst = arith.constant dense<0.000000e+00> : vector<1x16x128xf32>
    %3 = tpu.matmul %1, %2, %cst {dimension_numbers = #tpu.dot_dimension_numbers<[2], [1], [1], [2], [0, 0, 0, 1, 1, 2], [0], [0]>} : vector<1x16x16xbf16>, vector<1x16x128xbf16>, vector<1x16x128xf32> -> vector<1x16x128xf32>
    "tpu.trace_stop"() : () -> ()
    %4 = arith.truncf %3 : vector<1x16x128xf32> to vector<1x16x128xbf16>
    %5 = vector.shape_cast %4 : vector<1x16x128xbf16> to vector<16x128xbf16>
    %c0_5 = arith.constant 0 : index
    %c0_6 = arith.constant 0 : index
    %6 = vector.load %arg5[%c0_5, %c0_6] : memref<128x128xbf16, #tpu.memory_space<vmem>>, vector<128x128xbf16>
    %cst_7 = arith.constant dense<0.000000e+00> : vector<16x128xf32>
    %7 = tpu.matmul %5, %6, %cst_7 {dimension_numbers = #tpu.dot_dimension_numbers<[1], [0], [0], [1], [0, 0, 1, 1], [], []>} : vector<16x128xbf16>, vector<128x128xbf16>, vector<16x128xf32> -> vector<16x128xf32>
    %8 = vector.shape_cast %7 : vector<16x128xf32> to vector<1x16x128xf32>
    %c0_8 = arith.constant 0 : index
    %c0_9 = arith.constant 0 : index
    %9 = vector.load %arg6[%c0_8, %c0_9] : memref<1x128xf32, #tpu.memory_space<vmem>>, vector<1x128xf32>
    %10 = vector.shape_cast %9 : vector<1x128xf32> to vector<1x1x128xf32>
    %11 = vector.broadcast %10 : vector<1x1x128xf32> to vector<1x16x128xf32>
    %12 = arith.addf %8, %11 : vector<1x16x128xf32>
    %c0_10 = arith.constant 0 : index
    %c0_11 = arith.constant 0 : index
    %13 = memref.load %arg2[%c0_10, %c0_11] : memref<1x1xf32, #tpu.memory_space<smem>>
    %cst_12 = arith.constant 0.000000e+00 : f32
    %14 = vector.broadcast %cst_12 : f32 to vector<1x16x128xf32>
    %15 = arith.cmpf ogt, %12, %14 : vector<1x16x128xf32>
    %16 = vector.broadcast %13 : f32 to vector<1x16x128xf32>
    %17 = arith.mulf %16, %12 : vector<1x16x128xf32>
    %18 = arith.select %15, %12, %17 : vector<1x16x128xi1>, vector<1x16x128xf32>
    %19 = arith.truncf %18 : vector<1x16x128xf32> to vector<1x16x128xbf16>
    %c0_13 = arith.constant 0 : index
    %c0_14 = arith.constant 0 : index
    %c0_15 = arith.constant 0 : index
    %20 = vector.load %arg7[%c0_13, %c0_14, %c0_15] : memref<1x16x128xbf16, #tpu.memory_space<vmem>>, vector<1x16x128xbf16>
    tpu.vector_store %arg7[%c0_13, %c0_14, %c0_15], %19 {strides = array<i32>} : memref<1x16x128xbf16, #tpu.memory_space<vmem>>, vector<1x16x128xbf16>,
    return
  }
  func.func @transform_0(%arg0: i32, %arg1: i32) -> (i32, i32) {
    %c0_i32 = arith.constant 0 : i32
    %c0_i32_0 = arith.constant 0 : i32
    %c0_i32_1 = arith.constant 0 : i32
    return %c0_i32, %c0_i32_0 : i32, i32
  }
  func.func @transform_1(%arg0: i32, %arg1: i32) -> (i32, i32, i32) {
    %c0_i32 = arith.constant 0 : i32
    %c0_i32_0 = arith.constant 0 : i32
    %c0_i32_1 = arith.constant 0 : i32
    return %arg0, %c0_i32, %c0_i32_0 : i32, i32, i32
  }
  func.func @transform_2(%arg0: i32, %arg1: i32) -> (i32, i32, i32) {
    %c0_i32 = arith.constant 0 : i32
    %c0_i32_0 = arith.constant 0 : i32
    return %arg0, %arg1, %c0_i32 : i32, i32, i32
  }
  func.func @transform_3(%arg0: i32, %arg1: i32) -> (i32, i32) {
    %c0_i32 = arith.constant 0 : i32
    %c0_i32_0 = arith.constant 0 : i32
    %c0_i32_1 = arith.constant 0 : i32
    return %c0_i32, %c0_i32_0 : i32, i32
  }
  func.func @transform_4(%arg0: i32, %arg1: i32) -> (i32, i32) {
    %c0_i32 = arith.constant 0 : i32
    %c0_i32_0 = arith.constant 0 : i32
    %c0_i32_1 = arith.constant 0 : i32
    return %c0_i32, %c0_i32_0 : i32, i32
  }
  func.func @transform_5(%arg0: i32, %arg1: i32) -> (i32, i32, i32) {
    %c0_i32 = arith.constant 0 : i32
    %c0_i32_0 = arith.constant 0 : i32
    return %arg0, %arg1, %c0_i32 : i32, i32, i32
  }
}

module attributes {stable_mosaic.version = 11 : i64} {
  func.func @kernel(%arg0: i32, %arg1: i32, %arg2: memref<1x1xf32, #tpu.memory_space<smem>>, %arg3: memref<1x16x128xbf16, #tpu.memory_space<vmem>>, %arg4: memref<1x16x16xf32, #tpu.memory_space<vmem>>, %arg5: memref<128x128xbf16, #tpu.memory_space<vmem>>, %arg6: memref<1x128xf32, #tpu.memory_space<vmem>>, %arg7: memref<1x16x128xbf16, #tpu.memory_space<vmem>>) attributes {dimension_semantics = [#tpu.dimension_semantics<parallel>, #tpu.dimension_semantics<parallel>], iteration_bounds = array<i64: 2, 1>, scalar_prefetch = 0 : i64, scratch_operands = 0 : i64, tpu.core_type = #tpu.core_type<tc>, window_params = [{transform_indices = @transform_0, window_bounds = array<i64: 1, 1>}, {transform_indices = @transform_1, window_bounds = array<i64: 1, 16, 128>}, {transform_indices = @transform_2, window_bounds = array<i64: 1, 16, 16>}, {pipeline_mode = #tpu.pipeline_mode<synchronous>, transform_indices = @transform_3, window_bounds = array<i64: 128, 128>}, {pipeline_mode = #tpu.pipeline_mode<synchronous>, transform_indices = @transform_4, window_bounds = array<i64: 1, 128>}, {transform_indices = @transform_5, window_bounds = array<i64: 1, 16, 128>}]} {
    %c0 = arith.constant 0 : index
    %c0_0 = arith.constant 0 : index
    %c0_1 = arith.constant 0 : index
    %0 = vector.load %arg4[%c0, %c0_0, %c0_1] : memref<1x16x16xf32, #tpu.memory_space<vmem>>, vector<1x16x16xf32>
    %1 = arith.truncf %0 : vector<1x16x16xf32> to vector<1x16x16xbf16>
    %c0_2 = arith.constant 0 : index
    %c0_3 = arith.constant 0 : index
    %c0_4 = arith.constant 0 : index
    %2 = vector.load %arg3[%c0_2, %c0_3, %c0_4] : memref<1x16x128xbf16, #tpu.memory_space<vmem>>, vector<1x16x128xbf16>
    "tpu.trace_start"() <{level = 10 : i32, message = "brn,bnk->brk"}> : () -> ()
    %cst = arith.constant dense<0.000000e+00> : vector<1x16x128xf32>
    %3 = tpu.matmul %1, %2, %cst {dimension_numbers = #tpu.dot_dimension_numbers<[2], [1], [1], [2], [0, 0, 0, 1, 1, 2], [0], [0]>} : vector<1x16x16xbf16>, vector<1x16x128xbf16>, vector<1x16x128xf32> -> vector<1x16x128xf32>
    "tpu.trace_stop"() : () -> ()
    %4 = arith.truncf %3 : vector<1x16x128xf32> to vector<1x16x128xbf16>
    %5 = vector.shape_cast %4 : vector<1x16x128xbf16> to vector<16x128xbf16>
    %c0_5 = arith.constant 0 : index
    %c0_6 = arith.constant 0 : index
    %6 = vector.load %arg5[%c0_5, %c0_6] : memref<128x128xbf16, #tpu.memory_space<vmem>>, vector<128x128xbf16>
    %cst_7 = arith.constant dense<0.000000e+00> : vector<16x128xf32>
    %7 = tpu.matmul %5, %6, %cst_7 {dimension_numbers = #tpu.dot_dimension_numbers<[1], [0], [0], [1], [0, 0, 1, 1], [], []>} : vector<16x128xbf16>, vector<128x128xbf16>, vector<16x128xf32> -> vector<16x128xf32>
    %8 = vector.shape_cast %7 : vector<16x128xf32> to vector<1x16x128xf32>
    %c0_8 = arith.constant 0 : index
    %c0_9 = arith.constant 0 : index
    %9 = vector.load %arg6[%c0_8, %c0_9] : memref<1x128xf32, #tpu.memory_space<vmem>>, vector<1x128xf32>
    %10 = vector.shape_cast %9 : vector<1x128xf32> to vector<1x1x128xf32>
    %11 = vector.broadcast %10 : vector<1x1x128xf32> to vector<1x16x128xf32>
    %12 = arith.addf %8, %11 : vector<1x16x128xf32>
    %c0_10 = arith.constant 0 : index
    %c0_11 = arith.constant 0 : index
    %13 = memref.load %arg2[%c0_10, %c0_11] : memref<1x1xf32, #tpu.memory_space<smem>>
    %cst_12 = arith.constant 0.000000e+00 : f32
    %14 = vector.broadcast %cst_12 : f32 to vector<1x16x128xf32>
    %15 = arith.cmpf ogt, %12, %14 : vector<1x16x128xf32>
    %16 = vector.broadcast %13 : f32 to vector<1x16x128xf32>
    %17 = arith.mulf %16, %12 : vector<1x16x128xf32>
    %18 = arith.select %15, %12, %17 : vector<1x16x128xi1>, vector<1x16x128xf32>
    %19 = arith.truncf %18 : vector<1x16x128xf32> to vector<1x16x128xbf16>
    %c0_13 = arith.constant 0 : index
    %c0_14 = arith.constant 0 : index
    %c0_15 = arith.constant 0 : index
    %20 = vector.load %arg7[%c0_13, %c0_14, %c0_15] : memref<1x16x128xbf16, #tpu.memory_space<vmem>>, vector<1x16x128xbf16>
    tpu.vector_store %arg7[%c0_13, %c0_14, %c0_15], %19 {strides = array<i32>} : memref<1x16x128xbf16, #tpu.memory_space<vmem>>, vector<1x16x128xbf16>,
    return
  }
  func.func @transform_0(%arg0: i32, %arg1: i32) -> (i32, i32) {
    %c0_i32 = arith.constant 0 : i32
    %c0_i32_0 = arith.constant 0 : i32
    %c0_i32_1 = arith.constant 0 : i32
    return %c0_i32, %c0_i32_0 : i32, i32
  }
  func.func @transform_1(%arg0: i32, %arg1: i32) -> (i32, i32, i32) {
    %c0_i32 = arith.constant 0 : i32
    %c0_i32_0 = arith.constant 0 : i32
    %c0_i32_1 = arith.constant 0 : i32
    return %arg0, %c0_i32, %c0_i32_0 : i32, i32, i32
  }
  func.func @transform_2(%arg0: i32, %arg1: i32) -> (i32, i32, i32) {
    %c0_i32 = arith.constant 0 : i32
    %c0_i32_0 = arith.constant 0 : i32
    return %arg0, %arg1, %c0_i32 : i32, i32, i32
  }
  func.func @transform_3(%arg0: i32, %arg1: i32) -> (i32, i32) {
    %c0_i32 = arith.constant 0 : i32
    %c0_i32_0 = arith.constant 0 : i32
    %c0_i32_1 = arith.constant 0 : i32
    return %c0_i32, %c0_i32_0 : i32, i32
  }
  func.func @transform_4(%arg0: i32, %arg1: i32) -> (i32, i32) {
    %c0_i32 = arith.constant 0 : i32
    %c0_i32_0 = arith.constant 0 : i32
    %c0_i32_1 = arith.constant 0 : i32
    return %c0_i32, %c0_i32_0 : i32, i32
  }
  func.func @transform_5(%arg0: i32, %arg1: i32) -> (i32, i32, i32) {
    %c0_i32 = arith.constant 0 : i32
    %c0_i32_0 = arith.constant 0 : i32
    return %arg0, %arg1, %c0_i32 : i32, i32, i32
  }
}

</mosaic_0001>

<bundles_post_ra>
// kernel: tpu_custom_call.1
= control target key start
LH: loop header
LB: loop body
LE: loop exit
PB: predicated region body
PF: predicated region fallthrough
CT: control target
= control target key end

     0   :  { %s1250_s0 = inlined_call_operand.<no memory space> [shape: f32[1,1], index: 0, kind: input, shape index: {}]   ;;  %s1251_s1 = inlined_call_operand.hbm [shape: bf16[2,16,128], index: 1, kind: input, shape index: {}]   ;;  %s1252_s2 = inlined_call_operand.hbm [shape: f32[2,16,16], index: 2, kind: input, shape index: {}]   ;;  %s1253_s3 = inlined_call_operand.hbm [shape: bf16[128,128], index: 3, kind: input, shape index: {}]   ;;  %s1254_s4 = inlined_call_operand.vmem [shape: f32[1,128], index: 4, kind: input, shape index: {}]   ;;  %s1255_s5 = inlined_call_operand.hbm [shape: bf16[2,16,128], index: 5, kind: output, shape index: {}]  }
   0x1   :  { %1262 = sst [smem:[#allocation18_spill]] %s1251_s1 }
   0x2   :  { %1263 = sst [smem:[#allocation19_spill]] %s1253_s3 }
   0x3   :  { %10 = sst [smem:[#allocation2]] %s1250_s0 }
   0x4   :  { %11 = vsyncpa [#allocation4], 0 }
   0x5   :  { %13 = vsyncpa [#allocation4 + $0x1], 0 }
   0x6   :  { %14 = vsyncpa [#allocation7], 0 }
   0x7   :  { %16 = vsyncpa [#allocation7 + $0x1], 0 }
   0x8   :  { %17 = vsyncpa [#allocation5], 0 }
   0x9   :  { %19 = vsyncpa [#allocation5 + $0x1], 0  ;;  %s1036_s20 = smov 0   ;;  %s1038_s21 = smov 0  }
   0xa   :  { %s1040_s22 = smov 0   ;;  %s1042_s23 = smov 0  }
   0xb   :  { %s1044_s24 = smov 0   ;;  %s1046_s25 = smov 0  }
   0xc LB: > { %1264 = sst [smem:[#allocation14_spill]] %s977_s22  ;;  %s1067_s0 = sadd.s32 4294967295, %s989_s25   ;;  %s989_s25 = sphi %s1046_s25, %s25_s25   ;;  %s985_s24 = sphi %s1044_s24, %s1288_s24   ;;  %s981_s23 = sphi %s1042_s23, %s1287_s23   ;;  %s977_s22 = sphi %s1040_s22, %s1283_s22   ;;  %s973_s21 = sphi %s1038_s21, %s1286_s21   ;;  %s969_s20 = sphi %s1036_s20, %s1285_s20  }
   0xd   : > { %1265 = sst [smem:[#allocation15_spill]] %s989_s25  ;;  %s644_s26 = sadd.s32 4294967294, %s989_s25  }
   0xe   : > { %p78_p0 = scmp.ne.s32.totalorder %s973_s21, %s969_s20  ;;  %p79_p1 = scmp.eq.s32.totalorder %s1067_s0, 0 }
   0xf   : > { %p180_p3 = scmp.eq.s32.totalorder %s644_s26, 1  ;;  %p645_p5 = scmp.ge.s32.totalorder %s989_s25, 1 }
  0x10   : > { %p1076_p4 = por %p79_p1, %p78_p0  ;;  %p187_p7 = scmp.lt.s32.totalorder %s989_s25, 3 }
  0x11   : > { %p1081_p6 = por %p180_p3, %p78_p0  ;;  %s991_s30 = smov [#allocation8]  }
  0x12   : > { %p1086_p8 = pnand %p645_p5, %p187_p7  ;;  %s202_s6 = sshll.u32 %s991_s30, 4  ;;  %s203_s6 = int_to_ptr.vmem [resolvable:$true] %s202_s6 }
  0x13   : > { %s1267_s28 = scalar_select %p1081_p6, 1, 0 }
  0x14   : > { %p734_p9 = pneg %p1086_p8  ;;  %p647_p10 = scmp.ge.s32.totalorder %s989_s25, 2 }
  0x15   : > { %s37_s8 = sadd.s32 1, %s985_s24  ;;  %s830_s9 = scalar_lea.vmem %s203_s6, 1024 }
  0x16   : > { %p1095_p11 = pnand %p734_p9, %p79_p1  ;;  %p831_p13 = scmp.ne.s32.totalorder %s203_s6, %s830_s9 }
  0x17   : > { %p838_p5 = scmp.lt.s32.totalorder %s203_s6, %s203_s6  ;;  %p839_p7 = scmp.lt.s32.totalorder %s830_s9, %s830_s9 }
  0x18   : > { %p821_p12 = pneg %p1095_p11 }
  0x19   : > { %p840_p2 = por %p839_p7, %p838_p5 }
  0x1a   : > { %p833_p0 = pnand %p831_p13, %p821_p12 }
  0x1c   : > { %p834_p3 = pneg %p833_p0 }
  0x1e   : > { %p841_p6 = pnand %p840_p2, %p834_p3 }
  0x20   : > { %844 = shalt.err (!%p841_p6)
}
  0x21   : > { %s1256_s10 = smov 64   ;;  %s1257_s11 = smov 4  }
  0x22   : > { %s1270_s3 = sld [smem:[#allocation19_spill]]  ;;  %p39_p2 = scmp.ge.s32.totalorder %s37_s8, 2 }
  0x23   : > { %s65_s14 = sadd.s32 1, %s977_s22  ;;  %p72_p6 = scmp.ne.s32.totalorder %s977_s22, %s973_s21 }
  0x24   : > { %p73_p9 = scmp.eq.s32.totalorder %s989_s25, 0  ;;  %s1290_s8 = smov (%p39_p2, %s37_s8), 0 }
  0x25   : > { %1271 = sst [smem:[#allocation16_spill]] %s1290_s8  ;;  %p1273_p13 = scmp.eq.s32.totalorder %s1067_s0, 1 }
  0x26   : > { %p1116_p12 = por %p73_p9, %p72_p6  ;;  %s62_s17 = ssub.s32 %s985_s24, %s1290_s8 }
  0x27   : > { %p1122_p0 = por %p1273_p13, %p72_p6  ;;  %p63_p3 = scmp.eq.s32.totalorder %s62_s17, 0 }
  0x28   : > { %737 = dma.hbm_to_vmem [thread:$0]  (!%p1095_p11), %s1270_s3, 1024, %s203_s6, [#allocation7], %s1256_s10, %s1256_s10, %s1257_s11  }
  0x29   : > { %p750_p11 = scmp.lt.s32.totalorder %s989_s25, 2  ;;  %s1130_s18 = sand.u32 1, %s977_s22  }
  0x2a   : > { %s648_s19 = sshll.u32 %s1130_s18, 3  ;;  %s677_s30 = sshll.u32 %s985_s24, 7 }
  0x2b   : > { %s1134_s26 = scalar_select %p63_p3, %s977_s22, %s65_s14  }
  0x2c   : > { %s1276_s1 = sld [smem:[#allocation18_spill]]  ;;  %s223_s12 = scalar_lea.vmem [#allocation3], %s648_s19 }
  0x2d   : > { %1275 = sst [smem:[#allocation17_spill]] %s1134_s26  ;;  %s230_s13 = sshll.u32 %s223_s12, 4  ;;  %s231_s13 = int_to_ptr.vmem [resolvable:$true] %s230_s13 }
  0x2e   : > { %p1142_p5 = pnand %p750_p11, %p1116_p12  ;;  %s240_s17 = sand.u32 1, %s989_s25  }
  0x2f   : > { %s651_s11 = sshll.u32 %s1130_s18, 4  ;;  %s220_s3 = scalar_lea.sflag [#allocation4], %s1130_s18 }
  0x30   : > { %p847_p7 = pneg %p1142_p5  ;;  %s858_s14 = scalar_lea.vmem %s231_s13, 128 }
  0x31   : > { %p859_p2 = scmp.ne.s32.totalorder %s231_s13, %s858_s14  ;;  %s994_s19 = smov [#allocation3]  }
  0x32   : > { %s229_s9 = scalar_lea.hbm %s1276_s1, %s677_s30  ;;  %s863_s30 = sshll.u32 %s994_s19, 4  ;;  %s864_s30 = int_to_ptr.vmem [resolvable:$false] %s863_s30 }
  0x33   : > { %p861_p6 = pnand %p859_p2, %p847_p7  ;;  %s865_s15 = scalar_lea.vmem %s864_s30, 256 }
  0x34   : > { %p866_p12 = scmp.lt.s32.totalorder %s231_s13, %s864_s30  ;;  %p867_p13 = scmp.lt.s32.totalorder %s865_s15, %s858_s14 }
  0x35   : > { %p862_p9 = pneg %p861_p6 }
  0x36   : > { %p868_p11 = por %p867_p13, %p866_p12 }
  0x38   : > { %p869_p3 = pnand %p868_p11, %p862_p9 }
  0x3a   : > { %872 = shalt.err (!%p869_p3)
}
  0x3b   : > { %s1278_s18 = smov 4   ;;  %s1279_s6 = smov 64  }
  0x3c   : > { %741 = dma.hbm_to_vmem [thread:$0]  (!%p1142_p5), %s229_s9, 128, %s231_s13, %s220_s3, %s1279_s6, %s1279_s6, %s1278_s18  }
  0x3d   : > { %s678_s7 = sshll.u32 %s985_s24, 8  ;;  %s244_s8 = scalar_lea.vmem [#allocation6], %s651_s11 }
  0x3e   : > { %s252_s19 = scalar_lea.hbm %s1252_s2, %s678_s7  ;;  %s253_s26 = sshll.u32 %s244_s8, 4  ;;  %s254_s26 = int_to_ptr.vmem [resolvable:$true] %s253_s26 }
  0x3f   : > { %s241_s14 = scalar_lea.sflag [#allocation7], %s240_s17  ;;  %s886_s30 = scalar_lea.vmem %s254_s26, 256 }
  0x40   : > { %p887_p2 = scmp.ne.s32.totalorder %s254_s26, %s886_s30  ;;  %s995_s15 = smov [#allocation6]  }
  0x41   : > { %s891_s22 = sshll.u32 %s995_s15, 4  ;;  %s892_s22 = int_to_ptr.vmem [resolvable:$false] %s891_s22 }
  0x42   : > { %p889_p6 = pnand %p887_p2, %p847_p7  ;;  %s893_s25 = scalar_lea.vmem %s892_s22, 512 }
  0x43   : > { %p894_p12 = scmp.lt.s32.totalorder %s254_s26, %s892_s22  ;;  %p895_p13 = scmp.lt.s32.totalorder %s893_s25, %s886_s30 }
  0x44   : > { %p890_p9 = pneg %p889_p6 }
  0x45   : > { %p896_p11 = por %p895_p13, %p894_p12 }
  0x47   : > { %p897_p3 = pnand %p896_p11, %p890_p9 }
  0x49   : > { %900 = shalt.err (!%p897_p3)
}
  0x4a   : > { %s996_s1 = smov 128   ;;  %s997_s3 = smov 8  }
  0x4b   : > { %744 = dma.hbm_to_vmem [thread:$0]  (!%p1142_p5), %s252_s19, 256, %s254_s26, %s241_s14, %s996_s1, %s996_s1, %s997_s3  }
  0x4c   : > { %265 = sbr.rel (%p1086_p8) target bundleno = 510 (0x1fe), region = 40  ;;  %s1171_s8 = sand.u32 (!%p1086_p8), 1, %s973_s21  }
  0x4d   : > { %s655_s22 = sshll.u32 (!%p1086_p8), %s1171_s8, 3  ;;  %s268_s25 = scalar_lea.sflag (!%p1086_p8), [#allocation4], %s1171_s8 }
  0x4e   : > { %s271_s11 = scalar_lea.vmem (!%p1086_p8), [#allocation3], %s655_s22 }
  0x51   : > { %952 = dma.done.wait (%p1076_p4), %s268_s25, 128  }
  0x52   : > { %954 = vsyncadd (%p1076_p4), %s268_s25, 4294967168  ;;  %s276_s29 = sand.u32 1, %s1067_s0   ;;  %s656_s10 = sshll.u32 %s1171_s8, 4 }
  0x53   : > { %s277_s26 = scalar_lea.sflag [#allocation7], %s276_s29  ;;  %s280_s9 = scalar_lea.vmem [#allocation6], %s656_s10 }
  0x54   : > { %956 = dma.done.wait (%p1076_p4), %s277_s26, 256  }
  0x55   : > { %958 = vsyncadd (%p1076_p4), %s277_s26, 4294967040 }
  0x56   : > { %960 = dma.done.wait (%p79_p1), [#allocation7], 1024  }
  0x57   : > { %962 = vsyncadd (%p79_p1), [#allocation7], 4294966272  ;;  %v998_v0 = vmov 0.0   ;;  %vm999_vm0 = vmmov 0   ;;  %v810_v1 = vld [vmem:[%s271_s11] sm:$0xff]   ;;  %v319_v2 = vld [vmem:[%s280_s9] sm:$0xff] }
  0x58   : > { %698 = vmatprep.subr.bf16.mxu0 %v998_v0  ;;  %700 = vmatprep.mubr.msk.bf16.mxu0 %vm999_vm0, %v998_v0  ;;  %v320_v3 = vld [vmem:[%s280_s9 + $0x8] sm:$0xff]  ;;  %vm330_vm1 = vcmask 130048   ;;  %v812_v6 = vld [vmem:[#allocation8 + $0x30] sm:$0xff]   ;;  %v814_v8 = vld [vmem:[#allocation8 + $0x20] sm:$0xff]   ;;  %s490_s0 = sld [smem:[#allocation2]]  ;;  %s681_s17 = sshll.u32 %s981_s23, 7 }
  0x59   : > { %704 = vmatprep.subr.bf16.mxu1 %v998_v0  ;;  %720 = vmatprep.mubr.msk.bf16.mxu1 %vm999_vm0, %v998_v0  ;;  %v321_v4 = vpack.c.bf16 %v320_v3, %v319_v2  ;;  %v811_v5 = vld [vmem:[#allocation8 + $0x38] sm:$0xff]   ;;  %v813_v7 = vld [vmem:[#allocation8 + $0x28] sm:$0xff]   ;;  %v816_v10 = vld [vmem:[#allocation8 + $0x10] sm:$0xff]   ;;  %s315_s18 = scalar_lea.vmem [#allocation9], %s655_s22  ;;  %s1200_s19 = scalar_lea.hbm %s1255_s5, %s681_s17 }
  0x5a   : > { %699 = vmatpush3.bf16.msra.mxu0 %v810_v1  ;;  %705 = vmatpush3.bf16.msra.mxu1 %v811_v5  ;;  %v815_v9 = vld [vmem:[#allocation8 + $0x18] sm:$0xff]   ;;  %v817_v11 = vld [vmem:[#allocation8 + $0x8] sm:$0xff]   ;;  %v818_v12 = vld [vmem:[#allocation8] sm:$0xff]   ;;  %s524_s6 = sshll.u32 %s315_s18, 4  ;;  %s509_s23 = scalar_lea.sflag [#allocation5], %s1171_s8  ;;  %s1202_s6 = int_to_ptr.vmem [resolvable:$true] %s524_s6 }
  0x5b   : > { %706 = vmatprep.subr.bf16.mxu1 %v998_v0  ;;  %v669_v18 = vld [vmem:[%s1254_s4] ss:$0 sm:$0xff]  ;;  %s901_s14 = scalar_lea.vmem %s1202_s6, 128  ;;  %s1000_s30 = smov [#allocation9]  }
  0x5c   : > { %p902_p1 = scmp.ne.s32.totalorder %s1202_s6, %s901_s14  ;;  %s905_s15 = sshll.u32 %s1000_s30, 4  ;;  %s906_s15 = int_to_ptr.vmem [resolvable:$false] %s905_s15 }
  0x5d   : > { %701 = vmatmul.mubr.msk.bf16.vlgmr.msra.gmra.mxu0 %vm330_vm1, %v321_v4  ;;  %s907_s1 = scalar_lea.vmem %s906_s15, 256  ;;  %p908_p5 = scmp.lt.s32.totalorder %s1202_s6, %s906_s15 }
  0x5e   : > { %707 = vmatpush3.bf16.msra.mxu1 %v812_v6  ;;  %v493_v21 = vstv %s490_s0  ;;  %p903_p4 = pnand %p902_p1, %p1122_p0  ;;  %p909_p7 = scmp.lt.s32.totalorder %s907_s1, %s901_s14 }
  0x5f   : > { %708 = vmatprep.subr.bf16.mxu1 %v998_v0 }
  0x60   : > { %p904_p8 = pneg %p903_p4  ;;  %p910_p2 = por %p909_p7, %p908_p5 }
  0x62   : > { %709 = vmatpush3.bf16.msra.mxu1 %v813_v7  ;;  %p911_p6 = pnand %p910_p2, %p904_p8 }
  0x63   : > { %710 = vmatprep.subr.bf16.mxu1 %v998_v0 }
  0x66   : > { %711 = vmatpush3.bf16.msra.mxu1 %v814_v8 }
  0x67   : > { %712 = vmatprep.subr.bf16.mxu1 %v998_v0 }
  0x6a   : > { %713 = vmatpush3.bf16.msra.mxu1 %v815_v9 }
  0x6b   : > { %714 = vmatprep.subr.bf16.mxu1 %v998_v0 }
  0x6e   : > { %715 = vmatpush3.bf16.msra.mxu1 %v816_v10 }
  0x6f   : > { %716 = vmatprep.subr.bf16.mxu1 %v998_v0 }
  0x72   : > { %717 = vmatpush3.bf16.msra.mxu1 %v817_v11 }
  0x73   : > { %718 = vmatprep.subr.bf16.mxu1 %v998_v0 }
  0x76   : > { %719 = vmatpush3.bf16.msra.mxu1 %v818_v12 }
 0x11d   : > { %v368_v13 = vpop.f32.mrf.mxu0 }
 0x11f   : > { %v702_v14 = vpop.f32.mrf.mxu0 }
 0x121   : > { %v371_v15 = vpop.f32.mrf.mxu0 }
 0x122   : > { %v375_v16 = vpack.c.bf16 %v371_v15, %v368_v13 }
 0x123   : > { %v703_v17 = vpop.f32.mrf.mxu0 }
 0x124   : > { %721 = vmatmul.mubr.bf16.vlgmr.msra.gmra.mxu1 %v375_v16 }
 0x1e4   : > { %v474_v19 = vpop.f32.mrf.mxu1 }
 0x1e5   : > { %v488_v20 = vadd.f32 %v669_v18, %v474_v19 }
 0x1e6   : > { %v722_v22 = vpop.f32.mrf.mxu1 }
 0x1e7   : > { %v494_v24 = vmul.f32 %v493_v21, %v488_v20  ;;  %vm491_vm2 = vcmp.gt.f32.partialorder %v488_v20, 0.0 }
 0x1e8   : > { %v477_v23 = vpop.f32.mrf.mxu1 }
 0x1e9   : > { %v489_v25 = vadd.f32 %v669_v18, %v477_v23  ;;  %v496_v28 = vsel %vm491_vm2, %v488_v20, %v494_v24 }
 0x1ea   : > { %v723_v26 = vpop.f32.mrf.mxu1 }
 0x1eb   : > { %vm492_vm3 = vcmp.gt.f32.partialorder %v489_v25, 0.0  ;;  %v495_v27 = vmul.f32 %v493_v21, %v489_v25 }
 0x1ed   : > { %v497_v29 = vsel %vm492_vm3, %v489_v25, %v495_v27 }
 0x1ee   : > { %v685_v30 = vpack.c.bf16 %v497_v29, %v496_v28 }
 0x1f0   : > { %686 = vst [vmem:[%s315_s18] sm:$0xff] %v685_v30  }
 0x1f1   : > { %914 = shalt.err (!%p911_p6)
}
 0x1f2   : > { %s915_s3 = scalar_lea.hbm %s1200_s19, 128  ;;  %s919_s11 = scalar_lea.hbm %s1255_s5, 256 }
 0x1f3   : > { %p916_p9 = scmp.ne.s32.totalorder %s1200_s19, %s915_s3  ;;  %p920_p11 = scmp.lt.s32.totalorder %s1200_s19, %s1255_s5 }
 0x1f4   : > { %p921_p3 = scmp.lt.s32.totalorder %s919_s11, %s915_s3 }
 0x1f5   : > { %p917_p12 = pnand %p916_p9, %p1122_p0 }
 0x1f6   : > { %p922_p1 = por %p921_p3, %p920_p11 }
 0x1f7   : > { %p918_p13 = pneg %p917_p12 }
 0x1f9   : > { %p923_p4 = pnand %p922_p1, %p918_p13 }
 0x1fb   : > { %926 = shalt.err (!%p923_p4)
}
 0x1fc   : > { %s1001_s26 = smov 64   ;;  %s1002_s9 = smov 4  }
 0x1fd   : > { %732 = dma.vmem_to_hbm [thread:$0]  (%p1122_p0), %s1202_s6, 128, %s1200_s19, %s509_s23, %s1001_s26, %s1001_s26, %s1002_s9  }
 0x1fe PF: > { %s1280_s0 = sld [smem:[#allocation15_spill]]  ;;  %s539_s27 = sand.u32 1, %s969_s20  }
 0x1ff   : > { %p1281_p8 = scmp.ne.s32.totalorder %s1267_s28, 0  ;;  %s540_s13 = scalar_lea.sflag [#allocation5], %s539_s27 }
 0x201   : > { %p746_p5 = pnand %p647_p10, %p1281_p8 }
 0x203   : > { %p747_p7 = pneg %p746_p5 }
 0x205   : > { %964 = dma.done.wait (%p747_p7), %s540_s13, 128  }
 0x206   : > { %966 = vsyncadd (%p747_p7), %s540_s13, 4294967168  ;;  %s25_s25 = sadd.s32 1, %s1280_s0   ;;  %s1282_s17 = sld [smem:[#allocation14_spill]] }
 0x207   : > { %p22_p2 = scmp.ge.s32.totalorder %s25_s25, 4   ;;  %s1283_s22 = sld [smem:[#allocation17_spill]] }
 0x208   : > { %s1284_s16 = sld [smem:[#allocation16_spill]]  ;;  %s1285_s20 = smov %s973_s21 }
 0x209   : > { %s1287_s23 = smov %s985_s24 }
 0x20a   :  { %24 = sbr.rel (!%p22_p2) target bundleno = 12 (0xc), region = 102 }
 0x20c   : > { %s1286_s21 = smov %s1282_s17 }
 0x20e   : > { %s1288_s24 = smov %s1284_s16 }
 0x20f   :  { %545 = vsyncpa [#allocation4], 1 }
 0x210   :  { %547 = vsyncpa [#allocation4 + $0x1], 1 }
 0x211   :  { %548 = vsyncpa [#allocation7], 1 }
 0x212   :  { %550 = vsyncpa [#allocation7 + $0x1], 1 }
 0x213   :  { %551 = vsyncpa [#allocation5], 1 }
 0x214   :  { %553 = vsyncpa [#allocation5 + $0x1], 1 }

// kernel: tpu_custom_call.1
= control target key start
LH: loop header
LB: loop body
LE: loop exit
PB: predicated region body
PF: predicated region fallthrough
CT: control target
= control target key end

     0   :  { %s1250_s0 = inlined_call_operand.<no memory space> [shape: f32[1,1], index: 0, kind: input, shape index: {}]   ;;  %s1251_s1 = inlined_call_operand.hbm [shape: bf16[2,16,128], index: 1, kind: input, shape index: {}]   ;;  %s1252_s2 = inlined_call_operand.hbm [shape: f32[2,16,16], index: 2, kind: input, shape index: {}]   ;;  %s1253_s3 = inlined_call_operand.hbm [shape: bf16[128,128], index: 3, kind: input, shape index: {}]   ;;  %s1254_s4 = inlined_call_operand.vmem [shape: f32[1,128], index: 4, kind: input, shape index: {}]   ;;  %s1255_s5 = inlined_call_operand.hbm [shape: bf16[2,16,128], index: 5, kind: output, shape index: {}]  }
   0x1   :  { %1262 = sst [smem:[#allocation18_spill]] %s1251_s1 }
   0x2   :  { %1263 = sst [smem:[#allocation19_spill]] %s1253_s3 }
   0x3   :  { %10 = sst [smem:[#allocation2]] %s1250_s0 }
   0x4   :  { %11 = vsyncpa [#allocation4], 0 }
   0x5   :  { %13 = vsyncpa [#allocation4 + $0x1], 0 }
   0x6   :  { %14 = vsyncpa [#allocation7], 0 }
   0x7   :  { %16 = vsyncpa [#allocation7 + $0x1], 0 }
   0x8   :  { %17 = vsyncpa [#allocation5], 0 }
   0x9   :  { %19 = vsyncpa [#allocation5 + $0x1], 0  ;;  %s1036_s20 = smov 0   ;;  %s1038_s21 = smov 0  }
   0xa   :  { %s1040_s22 = smov 0   ;;  %s1042_s23 = smov 0  }
   0xb   :  { %s1044_s24 = smov 0   ;;  %s1046_s25 = smov 0  }
   0xc LB: > { %1264 = sst [smem:[#allocation14_spill]] %s977_s22  ;;  %s1067_s0 = sadd.s32 4294967295, %s989_s25   ;;  %s989_s25 = sphi %s1046_s25, %s25_s25   ;;  %s985_s24 = sphi %s1044_s24, %s1288_s24   ;;  %s981_s23 = sphi %s1042_s23, %s1287_s23   ;;  %s977_s22 = sphi %s1040_s22, %s1283_s22   ;;  %s973_s21 = sphi %s1038_s21, %s1286_s21   ;;  %s969_s20 = sphi %s1036_s20, %s1285_s20  }
   0xd   : > { %1265 = sst [smem:[#allocation15_spill]] %s989_s25  ;;  %s644_s26 = sadd.s32 4294967294, %s989_s25  }
   0xe   : > { %p78_p0 = scmp.ne.s32.totalorder %s973_s21, %s969_s20  ;;  %p79_p1 = scmp.eq.s32.totalorder %s1067_s0, 0 }
   0xf   : > { %p180_p3 = scmp.eq.s32.totalorder %s644_s26, 1  ;;  %p645_p5 = scmp.ge.s32.totalorder %s989_s25, 1 }
  0x10   : > { %p1076_p4 = por %p79_p1, %p78_p0  ;;  %p187_p7 = scmp.lt.s32.totalorder %s989_s25, 3 }
  0x11   : > { %p1081_p6 = por %p180_p3, %p78_p0  ;;  %s991_s30 = smov [#allocation8]  }
  0x12   : > { %p1086_p8 = pnand %p645_p5, %p187_p7  ;;  %s202_s6 = sshll.u32 %s991_s30, 4  ;;  %s203_s6 = int_to_ptr.vmem [resolvable:$true] %s202_s6 }
  0x13   : > { %s1267_s28 = scalar_select %p1081_p6, 1, 0 }
  0x14   : > { %p734_p9 = pneg %p1086_p8  ;;  %p647_p10 = scmp.ge.s32.totalorder %s989_s25, 2 }
  0x15   : > { %s37_s8 = sadd.s32 1, %s985_s24  ;;  %s830_s9 = scalar_lea.vmem %s203_s6, 1024 }
  0x16   : > { %p1095_p11 = pnand %p734_p9, %p79_p1  ;;  %p831_p13 = scmp.ne.s32.totalorder %s203_s6, %s830_s9 }
  0x17   : > { %p838_p5 = scmp.lt.s32.totalorder %s203_s6, %s203_s6  ;;  %p839_p7 = scmp.lt.s32.totalorder %s830_s9, %s830_s9 }
  0x18   : > { %p821_p12 = pneg %p1095_p11 }
  0x19   : > { %p840_p2 = por %p839_p7, %p838_p5 }
  0x1a   : > { %p833_p0 = pnand %p831_p13, %p821_p12 }
  0x1c   : > { %p834_p3 = pneg %p833_p0 }
  0x1e   : > { %p841_p6 = pnand %p840_p2, %p834_p3 }
  0x20   : > { %844 = shalt.err (!%p841_p6)
}
  0x21   : > { %s1256_s10 = smov 64   ;;  %s1257_s11 = smov 4  }
  0x22   : > { %s1270_s3 = sld [smem:[#allocation19_spill]]  ;;  %p39_p2 = scmp.ge.s32.totalorder %s37_s8, 2 }
  0x23   : > { %s65_s14 = sadd.s32 1, %s977_s22  ;;  %p72_p6 = scmp.ne.s32.totalorder %s977_s22, %s973_s21 }
  0x24   : > { %p73_p9 = scmp.eq.s32.totalorder %s989_s25, 0  ;;  %s1290_s8 = smov (%p39_p2, %s37_s8), 0 }
  0x25   : > { %1271 = sst [smem:[#allocation16_spill]] %s1290_s8  ;;  %p1273_p13 = scmp.eq.s32.totalorder %s1067_s0, 1 }
  0x26   : > { %p1116_p12 = por %p73_p9, %p72_p6  ;;  %s62_s17 = ssub.s32 %s985_s24, %s1290_s8 }
  0x27   : > { %p1122_p0 = por %p1273_p13, %p72_p6  ;;  %p63_p3 = scmp.eq.s32.totalorder %s62_s17, 0 }
  0x28   : > { %737 = dma.hbm_to_vmem [thread:$0]  (!%p1095_p11), %s1270_s3, 1024, %s203_s6, [#allocation7], %s1256_s10, %s1256_s10, %s1257_s11  }
  0x29   : > { %p750_p11 = scmp.lt.s32.totalorder %s989_s25, 2  ;;  %s1130_s18 = sand.u32 1, %s977_s22  }
  0x2a   : > { %s648_s19 = sshll.u32 %s1130_s18, 3  ;;  %s677_s30 = sshll.u32 %s985_s24, 7 }
  0x2b   : > { %s1134_s26 = scalar_select %p63_p3, %s977_s22, %s65_s14  }
  0x2c   : > { %s1276_s1 = sld [smem:[#allocation18_spill]]  ;;  %s223_s12 = scalar_lea.vmem [#allocation3], %s648_s19 }
  0x2d   : > { %1275 = sst [smem:[#allocation17_spill]] %s1134_s26  ;;  %s230_s13 = sshll.u32 %s223_s12, 4  ;;  %s231_s13 = int_to_ptr.vmem [resolvable:$true] %s230_s13 }
  0x2e   : > { %p1142_p5 = pnand %p750_p11, %p1116_p12  ;;  %s240_s17 = sand.u32 1, %s989_s25  }
  0x2f   : > { %s651_s11 = sshll.u32 %s1130_s18, 4  ;;  %s220_s3 = scalar_lea.sflag [#allocation4], %s1130_s18 }
  0x30   : > { %p847_p7 = pneg %p1142_p5  ;;  %s858_s14 = scalar_lea.vmem %s231_s13, 128 }
  0x31   : > { %p859_p2 = scmp.ne.s32.totalorder %s231_s13, %s858_s14  ;;  %s994_s19 = smov [#allocation3]  }
  0x32   : > { %s229_s9 = scalar_lea.hbm %s1276_s1, %s677_s30  ;;  %s863_s30 = sshll.u32 %s994_s19, 4  ;;  %s864_s30 = int_to_ptr.vmem [resolvable:$false] %s863_s30 }
  0x33   : > { %p861_p6 = pnand %p859_p2, %p847_p7  ;;  %s865_s15 = scalar_lea.vmem %s864_s30, 256 }
  0x34   : > { %p866_p12 = scmp.lt.s32.totalorder %s231_s13, %s864_s30  ;;  %p867_p13 = scmp.lt.s32.totalorder %s865_s15, %s858_s14 }
  0x35   : > { %p862_p9 = pneg %p861_p6 }
  0x36   : > { %p868_p11 = por %p867_p13, %p866_p12 }
  0x38   : > { %p869_p3 = pnand %p868_p11, %p862_p9 }
  0x3a   : > { %872 = shalt.err (!%p869_p3)
}
  0x3b   : > { %s1278_s18 = smov 4   ;;  %s1279_s6 = smov 64  }
  0x3c   : > { %741 = dma.hbm_to_vmem [thread:$0]  (!%p1142_p5), %s229_s9, 128, %s231_s13, %s220_s3, %s1279_s6, %s1279_s6, %s1278_s18  }
  0x3d   : > { %s678_s7 = sshll.u32 %s985_s24, 8  ;;  %s244_s8 = scalar_lea.vmem [#allocation6], %s651_s11 }
  0x3e   : > { %s252_s19 = scalar_lea.hbm %s1252_s2, %s678_s7  ;;  %s253_s26 = sshll.u32 %s244_s8, 4  ;;  %s254_s26 = int_to_ptr.vmem [resolvable:$true] %s253_s26 }
  0x3f   : > { %s241_s14 = scalar_lea.sflag [#allocation7], %s240_s17  ;;  %s886_s30 = scalar_lea.vmem %s254_s26, 256 }
  0x40   : > { %p887_p2 = scmp.ne.s32.totalorder %s254_s26, %s886_s30  ;;  %s995_s15 = smov [#allocation6]  }
  0x41   : > { %s891_s22 = sshll.u32 %s995_s15, 4  ;;  %s892_s22 = int_to_ptr.vmem [resolvable:$false] %s891_s22 }
  0x42   : > { %p889_p6 = pnand %p887_p2, %p847_p7  ;;  %s893_s25 = scalar_lea.vmem %s892_s22, 512 }
  0x43   : > { %p894_p12 = scmp.lt.s32.totalorder %s254_s26, %s892_s22  ;;  %p895_p13 = scmp.lt.s32.totalorder %s893_s25, %s886_s30 }
  0x44   : > { %p890_p9 = pneg %p889_p6 }
  0x45   : > { %p896_p11 = por %p895_p13, %p894_p12 }
  0x47   : > { %p897_p3 = pnand %p896_p11, %p890_p9 }
  0x49   : > { %900 = shalt.err (!%p897_p3)
}
  0x4a   : > { %s996_s1 = smov 128   ;;  %s997_s3 = smov 8  }
  0x4b   : > { %744 = dma.hbm_to_vmem [thread:$0]  (!%p1142_p5), %s252_s19, 256, %s254_s26, %s241_s14, %s996_s1, %s996_s1, %s997_s3  }
  0x4c   : > { %265 = sbr.rel (%p1086_p8) target bundleno = 510 (0x1fe), region = 40  ;;  %s1171_s8 = sand.u32 (!%p1086_p8), 1, %s973_s21  }
  0x4d   : > { %s655_s22 = sshll.u32 (!%p1086_p8), %s1171_s8, 3  ;;  %s268_s25 = scalar_lea.sflag (!%p1086_p8), [#allocation4], %s1171_s8 }
  0x4e   : > { %s271_s11 = scalar_lea.vmem (!%p1086_p8), [#allocation3], %s655_s22 }
  0x51   : > { %952 = dma.done.wait (%p1076_p4), %s268_s25, 128  }
  0x52   : > { %954 = vsyncadd (%p1076_p4), %s268_s25, 4294967168  ;;  %s276_s29 = sand.u32 1, %s1067_s0   ;;  %s656_s10 = sshll.u32 %s1171_s8, 4 }
  0x53   : > { %s277_s26 = scalar_lea.sflag [#allocation7], %s276_s29  ;;  %s280_s9 = scalar_lea.vmem [#allocation6], %s656_s10 }
  0x54   : > { %956 = dma.done.wait (%p1076_p4), %s277_s26, 256  }
  0x55   : > { %958 = vsyncadd (%p1076_p4), %s277_s26, 4294967040 }
  0x56   : > { %960 = dma.done.wait (%p79_p1), [#allocation7], 1024  }
  0x57   : > { %962 = vsyncadd (%p79_p1), [#allocation7], 4294966272  ;;  %v998_v0 = vmov 0.0   ;;  %vm999_vm0 = vmmov 0   ;;  %v810_v1 = vld [vmem:[%s271_s11] sm:$0xff]   ;;  %v319_v2 = vld [vmem:[%s280_s9] sm:$0xff] }
  0x58   : > { %698 = vmatprep.subr.bf16.mxu0 %v998_v0  ;;  %700 = vmatprep.mubr.msk.bf16.mxu0 %vm999_vm0, %v998_v0  ;;  %v320_v3 = vld [vmem:[%s280_s9 + $0x8] sm:$0xff]  ;;  %vm330_vm1 = vcmask 130048   ;;  %v812_v6 = vld [vmem:[#allocation8 + $0x30] sm:$0xff]   ;;  %v814_v8 = vld [vmem:[#allocation8 + $0x20] sm:$0xff]   ;;  %s490_s0 = sld [smem:[#allocation2]]  ;;  %s681_s17 = sshll.u32 %s981_s23, 7 }
  0x59   : > { %704 = vmatprep.subr.bf16.mxu1 %v998_v0  ;;  %720 = vmatprep.mubr.msk.bf16.mxu1 %vm999_vm0, %v998_v0  ;;  %v321_v4 = vpack.c.bf16 %v320_v3, %v319_v2  ;;  %v811_v5 = vld [vmem:[#allocation8 + $0x38] sm:$0xff]   ;;  %v813_v7 = vld [vmem:[#allocation8 + $0x28] sm:$0xff]   ;;  %v816_v10 = vld [vmem:[#allocation8 + $0x10] sm:$0xff]   ;;  %s315_s18 = scalar_lea.vmem [#allocation9], %s655_s22  ;;  %s1200_s19 = scalar_lea.hbm %s1255_s5, %s681_s17 }
  0x5a   : > { %699 = vmatpush3.bf16.msra.mxu0 %v810_v1  ;;  %705 = vmatpush3.bf16.msra.mxu1 %v811_v5  ;;  %v815_v9 = vld [vmem:[#allocation8 + $0x18] sm:$0xff]   ;;  %v817_v11 = vld [vmem:[#allocation8 + $0x8] sm:$0xff]   ;;  %v818_v12 = vld [vmem:[#allocation8] sm:$0xff]   ;;  %s524_s6 = sshll.u32 %s315_s18, 4  ;;  %s509_s23 = scalar_lea.sflag [#allocation5], %s1171_s8  ;;  %s1202_s6 = int_to_ptr.vmem [resolvable:$true] %s524_s6 }
  0x5b   : > { %706 = vmatprep.subr.bf16.mxu1 %v998_v0  ;;  %v669_v18 = vld [vmem:[%s1254_s4] ss:$0 sm:$0xff]  ;;  %s901_s14 = scalar_lea.vmem %s1202_s6, 128  ;;  %s1000_s30 = smov [#allocation9]  }
  0x5c   : > { %p902_p1 = scmp.ne.s32.totalorder %s1202_s6, %s901_s14  ;;  %s905_s15 = sshll.u32 %s1000_s30, 4  ;;  %s906_s15 = int_to_ptr.vmem [resolvable:$false] %s905_s15 }
  0x5d   : > { %701 = vmatmul.mubr.msk.bf16.vlgmr.msra.gmra.mxu0 %vm330_vm1, %v321_v4  ;;  %s907_s1 = scalar_lea.vmem %s906_s15, 256  ;;  %p908_p5 = scmp.lt.s32.totalorder %s1202_s6, %s906_s15 }
  0x5e   : > { %707 = vmatpush3.bf16.msra.mxu1 %v812_v6  ;;  %v493_v21 = vstv %s490_s0  ;;  %p903_p4 = pnand %p902_p1, %p1122_p0  ;;  %p909_p7 = scmp.lt.s32.totalorder %s907_s1, %s901_s14 }
  0x5f   : > { %708 = vmatprep.subr.bf16.mxu1 %v998_v0 }
  0x60   : > { %p904_p8 = pneg %p903_p4  ;;  %p910_p2 = por %p909_p7, %p908_p5 }
  0x62   : > { %709 = vmatpush3.bf16.msra.mxu1 %v813_v7  ;;  %p911_p6 = pnand %p910_p2, %p904_p8 }
  0x63   : > { %710 = vmatprep.subr.bf16.mxu1 %v998_v0 }
  0x66   : > { %711 = vmatpush3.bf16.msra.mxu1 %v814_v8 }
  0x67   : > { %712 = vmatprep.subr.bf16.mxu1 %v998_v0 }
  0x6a   : > { %713 = vmatpush3.bf16.msra.mxu1 %v815_v9 }
  0x6b   : > { %714 = vmatprep.subr.bf16.mxu1 %v998_v0 }
  0x6e   : > { %715 = vmatpush3.bf16.msra.mxu1 %v816_v10 }
  0x6f   : > { %716 = vmatprep.subr.bf16.mxu1 %v998_v0 }
  0x72   : > { %717 = vmatpush3.bf16.msra.mxu1 %v817_v11 }
  0x73   : > { %718 = vmatprep.subr.bf16.mxu1 %v998_v0 }
  0x76   : > { %719 = vmatpush3.bf16.msra.mxu1 %v818_v12 }
 0x11d   : > { %v368_v13 = vpop.f32.mrf.mxu0 }
 0x11f   : > { %v702_v14 = vpop.f32.mrf.mxu0 }
 0x121   : > { %v371_v15 = vpop.f32.mrf.mxu0 }
 0x122   : > { %v375_v16 = vpack.c.bf16 %v371_v15, %v368_v13 }
 0x123   : > { %v703_v17 = vpop.f32.mrf.mxu0 }
 0x124   : > { %721 = vmatmul.mubr.bf16.vlgmr.msra.gmra.mxu1 %v375_v16 }
 0x1e4   : > { %v474_v19 = vpop.f32.mrf.mxu1 }
 0x1e5   : > { %v488_v20 = vadd.f32 %v669_v18, %v474_v19 }
 0x1e6   : > { %v722_v22 = vpop.f32.mrf.mxu1 }
 0x1e7   : > { %v494_v24 = vmul.f32 %v493_v21, %v488_v20  ;;  %vm491_vm2 = vcmp.gt.f32.partialorder %v488_v20, 0.0 }
 0x1e8   : > { %v477_v23 = vpop.f32.mrf.mxu1 }
 0x1e9   : > { %v489_v25 = vadd.f32 %v669_v18, %v477_v23  ;;  %v496_v28 = vsel %vm491_vm2, %v488_v20, %v494_v24 }
 0x1ea   : > { %v723_v26 = vpop.f32.mrf.mxu1 }
 0x1eb   : > { %vm492_vm3 = vcmp.gt.f32.partialorder %v489_v25, 0.0  ;;  %v495_v27 = vmul.f32 %v493_v21, %v489_v25 }
 0x1ed   : > { %v497_v29 = vsel %vm492_vm3, %v489_v25, %v495_v27 }
 0x1ee   : > { %v685_v30 = vpack.c.bf16 %v497_v29, %v496_v28 }
 0x1f0   : > { %686 = vst [vmem:[%s315_s18] sm:$0xff] %v685_v30  }
 0x1f1   : > { %914 = shalt.err (!%p911_p6)
}
 0x1f2   : > { %s915_s3 = scalar_lea.hbm %s1200_s19, 128  ;;  %s919_s11 = scalar_lea.hbm %s1255_s5, 256 }
 0x1f3   : > { %p916_p9 = scmp.ne.s32.totalorder %s1200_s19, %s915_s3  ;;  %p920_p11 = scmp.lt.s32.totalorder %s1200_s19, %s1255_s5 }
 0x1f4   : > { %p921_p3 = scmp.lt.s32.totalorder %s919_s11, %s915_s3 }
 0x1f5   : > { %p917_p12 = pnand %p916_p9, %p1122_p0 }
 0x1f6   : > { %p922_p1 = por %p921_p3, %p920_p11 }
 0x1f7   : > { %p918_p13 = pneg %p917_p12 }
 0x1f9   : > { %p923_p4 = pnand %p922_p1, %p918_p13 }
 0x1fb   : > { %926 = shalt.err (!%p923_p4)
}
 0x1fc   : > { %s1001_s26 = smov 64   ;;  %s1002_s9 = smov 4  }
 0x1fd   : > { %732 = dma.vmem_to_hbm [thread:$0]  (%p1122_p0), %s1202_s6, 128, %s1200_s19, %s509_s23, %s1001_s26, %s1001_s26, %s1002_s9  }
 0x1fe PF: > { %s1280_s0 = sld [smem:[#allocation15_spill]]  ;;  %s539_s27 = sand.u32 1, %s969_s20  }
 0x1ff   : > { %p1281_p8 = scmp.ne.s32.totalorder %s1267_s28, 0  ;;  %s540_s13 = scalar_lea.sflag [#allocation5], %s539_s27 }
 0x201   : > { %p746_p5 = pnand %p647_p10, %p1281_p8 }
 0x203   : > { %p747_p7 = pneg %p746_p5 }
 0x205   : > { %964 = dma.done.wait (%p747_p7), %s540_s13, 128  }
 0x206   : > { %966 = vsyncadd (%p747_p7), %s540_s13, 4294967168  ;;  %s25_s25 = sadd.s32 1, %s1280_s0   ;;  %s1282_s17 = sld [smem:[#allocation14_spill]] }
 0x207   : > { %p22_p2 = scmp.ge.s32.totalorder %s25_s25, 4   ;;  %s1283_s22 = sld [smem:[#allocation17_spill]] }
 0x208   : > { %s1284_s16 = sld [smem:[#allocation16_spill]]  ;;  %s1285_s20 = smov %s973_s21 }
 0x209   : > { %s1287_s23 = smov %s985_s24 }
 0x20a   :  { %24 = sbr.rel (!%p22_p2) target bundleno = 12 (0xc), region = 102 }
 0x20c   : > { %s1286_s21 = smov %s1282_s17 }
 0x20e   : > { %s1288_s24 = smov %s1284_s16 }
 0x20f   :  { %545 = vsyncpa [#allocation4], 1 }
 0x210   :  { %547 = vsyncpa [#allocation4 + $0x1], 1 }
 0x211   :  { %548 = vsyncpa [#allocation7], 1 }
 0x212   :  { %550 = vsyncpa [#allocation7 + $0x1], 1 }
 0x213   :  { %551 = vsyncpa [#allocation5], 1 }
 0x214   :  { %553 = vsyncpa [#allocation5 + $0x1], 1 }

</bundles_post_ra>
